<compile_context>
chip_gen: v5e
topology: v5e:2x2
jax: 0.10.0
libtpu: 0.0.40
codegen_flags: <defaults>
</compile_context>

<pallas_src>
import functools

import jax
import jax.numpy as jnp
from jax import lax
from jax.experimental import pallas as pl
from jax.experimental.pallas import tpu as pltpu


def _round_up(x, m):
    return -(-x // m) * m


def _vmem_budget_bytes():
    """~75% of physical per-core VMEM (chip-aware; conservative fallback)."""
    try:
        cap = int(pltpu.get_tpu_info().vmem_capacity_bytes)
    except Exception:
        cap = 64 * 2 ** 20          # conservative: v7x per-TC VMEM
    return (cap * 3) // 4


# ---------------------------------------------------------------------------
# stride == 1 fast path: lane-folded layout, NB images per grid step
# ---------------------------------------------------------------------------
def _mbconv_s1_kernel(xp_ref, wdw_ref, b1_ref, w1_ref, w2_ref, ssum_ref,
                      sexp_ref, g0_ref, b2_ref, o_ref, *,
                      K, pad, H, W, Ho, Wo, Cin, Cout, NB, WoCo_pad,
                      residual, mxu_dtype):
    # xp_ref : (NB, Hp, Wp*Cin)   zero-padded input (mxu dtype), W,C on lanes
    # wdw_ref: (K, K, 1, Wo*Cin)  depthwise weights * BN1 scale, tiled over Wo
    # b1_ref : (1, Wo*Cin)        BN1 bias, tiled over Wo (f32)
    # w1_ref : (Cin, Cr)          SE fc1 (f32, no bias)
    # w2_ref : (Cr, Cin)          SE fc2 (f32, no bias)
    # ssum   : (Wo*Cin, Cin)      channel-summing matrix (SE mean pool)
    # sexp   : (Cin, Wo*Cin)      channel-expanding matrix (broadcast e over W)
    # g0_ref : (Wo*Cin, WoCo_pad) block-diag 1x1 weights * BN2 scale (mxu dtype)
    # b2_ref : (1, WoCo_pad)      folded conv bias + BN2 bias (f32)
    # o_ref  : (NB, Ho, WoCo_pad) lane-dense output block
    WoC = Wo * Cin
    WoCo = Wo * Cout
    inv_hw = 1.0 / (Ho * Wo)

    # hoisted once per grid step (small; amortized over NB images)
    wdw = wdw_ref[...].astype(jnp.float32)
    b1 = b1_ref[...]
    w1 = w1_ref[...]
    w2 = w2_ref[...]
    ssum = ssum_ref[...].astype(jnp.float32)
    sexp = sexp_ref[...].astype(jnp.float32)
    g0 = g0_ref[...]                     # already mxu_dtype (pre-cast in wrapper)
    b2 = b2_ref[...]

    def body(n, carry):
        xn = xp_ref[n].astype(jnp.float32)          # (Hp, Wp*Cin)

        # --- depthwise conv (BN1 scale folded); first tap initializes acc ---
        acc = None
        for kh in range(K):
            for kw in range(K):
                tap = (xn[kh:kh + Ho, kw * Cin: kw * Cin + WoC]
                       * wdw[kh, kw])                # (1, WoC) broadcast
                acc = tap if acc is None else acc + tap
        z = acc + b1                                 # BN1 bias
        z = z * jax.nn.sigmoid(z)                    # SiLU (lane-dense)

        # --- SE: squeeze (global mean per channel) + excitation ---
        pooled = jnp.dot(z.sum(axis=0, keepdims=True), ssum,
                         preferred_element_type=jnp.float32) * inv_hw  # (1, Cin)
        h = jnp.dot(pooled, w1, preferred_element_type=jnp.float32)
        h = h * jax.nn.sigmoid(h)
        e = jax.nn.sigmoid(
            jnp.dot(h, w2, preferred_element_type=jnp.float32))        # (1, Cin)
        zs = z * jnp.dot(e, sexp, preferred_element_type=jnp.float32)  # (Ho, WoC)

        # --- 1x1 conv + BN2 via block-diagonal weights (lane-dense output) ---
        out = jnp.dot(zs.astype(mxu_dtype), g0,
                      preferred_element_type=jnp.float32) + b2  # (Ho, WoCo_pad)

        if residual:
            # stochastic depth == identity in eval mode; residual comes from
            # the interior of the padded block already in VMEM (no extra DMA).
            res = xn[pad:pad + H, pad * Cin:(pad + W) * Cin]
            if WoCo_pad > WoCo:
                res = jnp.pad(res, ((0, 0), (0, WoCo_pad - WoCo)))
            out = out + res

        o_ref[n] = out.astype(o_ref.dtype)
        return carry

    # real loop (bounds live ranges; vreg pressure independent of NB)
    lax.fori_loop(0, NB, body, 0)


# ---------------------------------------------------------------------------
# generic fallback (stride != 1 or very large stride-1 feature maps)
# ---------------------------------------------------------------------------
def _mbconv_generic_kernel(xp_ref, wdw_ref, b1_ref, w1_ref, w2_ref, wpw_ref,
                           b2_ref, o_ref, *, K, stride, pad, H, W, Ho, Wo,
                           Cin, Cout_pad, residual, mxu_dtype):
    xp = xp_ref[0].astype(jnp.float32)              # (Hp, Wp, Cin)
    wdw = wdw_ref[...].astype(jnp.float32)          # (K, K, 1, Cin), BN1-folded

    acc = None
    for kh in range(K):
        for kw in range(K):
            xs = lax.slice(
                xp, (kh, kw, 0),
                (kh + (Ho - 1) * stride + 1, kw + (Wo - 1) * stride + 1, Cin),
                (stride, stride, 1))                # (Ho, Wo, Cin)
            t = xs * wdw[kh, kw]
            acc = t if acc is None else acc + t
    z = acc + b1_ref[...]
    z = z * jax.nn.sigmoid(z)

    zr = z.reshape(Ho * Wo, Cin)
    pooled = zr.sum(axis=0, keepdims=True) * (1.0 / (Ho * Wo))
    h = jnp.dot(pooled, w1_ref[...], preferred_element_type=jnp.float32)
    h = h * jax.nn.sigmoid(h)
    e = jax.nn.sigmoid(
        jnp.dot(h, w2_ref[...], preferred_element_type=jnp.float32))
    zs = zr * e

    # w_pw is pre-cast + pre-padded to (Cin, Cout_pad) in the wrapper
    out = jnp.dot(zs.astype(mxu_dtype), wpw_ref[...],
                  preferred_element_type=jnp.float32)
    out = out + b2_ref[...]
    if residual:
        res = lax.slice(xp, (pad, pad, 0),
                        (pad + H, pad + W, Cin)).reshape(H * W, Cin)
        if Cout_pad > Cin:
            res = jnp.pad(res, ((0, 0), (0, Cout_pad - Cin)))
        out = out + res
    o_ref[0] = out.astype(o_ref.dtype)


# ---------------------------------------------------------------------------
# wrapper
# ---------------------------------------------------------------------------
def mbconv1_forward(x_nchw, params, *, kernel=3, stride=1, padding=1,
                    mxu_dtype=jnp.bfloat16):
    N, Cin, H, W = x_nchw.shape
    K, pad = kernel, padding
    Cout = params["w_pw"].shape[1]
    Cr = params["w_se1"].shape[1]
    Ho = (H + 2 * pad - K) // stride + 1
    Wo = (W + 2 * pad - K) // stride + 1
    Hp, Wp = H + 2 * pad, W + 2 * pad
    residual = (Cin == Cout) and (stride == 1)

    const_dtype = mxu_dtype                  # heavy operands / activations
    csize = jnp.dtype(const_dtype).itemsize
    xsize = jnp.dtype(x_nchw.dtype).itemsize
    vmem_budget = _vmem_budget_bytes()

    # --- constant-fold BN1 / BN2 / conv bias into the weights ---
    scale1 = params["scale1"].reshape(Cin)
    bias1 = params["bias1"].reshape(Cin)
    scale2 = params["scale2"].reshape(Cout)
    bias2 = params["bias2"].reshape(Cout)
    w_dw = params["w_dw"].reshape(K, K, Cin) * scale1          # (K, K, Cin)
    w_pw = params["w_pw"] * scale2[None, :]                    # (Cin, Cout)
    b_out = params["b_pw"].reshape(Cout) * scale2 + bias2      # (Cout,)

    x = jnp.transpose(x_nchw, (0, 2, 3, 1))                    # NHWC
    xp = jnp.pad(x, ((0, 0), (pad, pad), (pad, pad), (0, 0)))

    WoC = Wo * Cin
    WoCo = Wo * Cout
    WoCo_pad = _round_up(WoCo, 128)          # lane-dense (unmasked) stores

    # TODO(synk): add a chip-aware (v5e) FLOP guard comparing the Wo-inflated
    #             block-diagonal matmul against the depthwise VPU work.
    use_folded = (stride == 1
                  and Wo * max(Cin, Cout) <= 2048
                  and WoC * WoCo_pad * csize <= 8 * 2 ** 20)

    if use_folded:
        WpC = Wp * Cin
        xpf = xp.reshape(N, Hp, WpC).astype(const_dtype)       # bf16 activations

        # chip-aware per-step activation budget; NB capped so Ngrid >= 2
        act_budget = max(vmem_budget // 4, 2 * 2 ** 20)
        per_img = 2 * (Hp * WpC * csize + Ho * WoCo_pad * xsize)
        NB = max(1, min(N, act_budget // max(per_img, 1)))
        if N >= 2:
            NB = min(NB, -(-N // 2))         # both v7x TensorCores get work
        Ngrid = -(-N // NB)
        Npad = Ngrid * NB
        if Npad != N:
            xpf = jnp.pad(xpf, ((0, Npad - N), (0, 0), (0, 0)))

        # lane-tiled / block-diagonal constants (heavy ones in const_dtype)
        w_dw_t = jnp.tile(w_dw, (1, 1, Wo)).reshape(K, K, 1, WoC)
        w_dw_t = w_dw_t.astype(const_dtype)
        b1_t = jnp.tile(bias1, (Wo,)).reshape(1, WoC)
        b2_t = jnp.pad(jnp.tile(b_out, (Wo,)),
                       (0, WoCo_pad - WoCo)).reshape(1, WoCo_pad)
        eye = jnp.eye(Cin, dtype=jnp.float32)
        ssum = jnp.tile(eye, (Wo, 1)).astype(const_dtype)      # (WoC, Cin)
        sexp = jnp.tile(eye, (1, Wo)).astype(const_dtype)      # (Cin, WoC)
        g0 = jnp.kron(jnp.eye(Wo, dtype=jnp.float32), w_pw)    # (WoC, WoCo)
        g0 = jnp.pad(g0, ((0, 0), (0, WoCo_pad - WoCo))).astype(const_dtype)

        kernel_fn = functools.partial(
            _mbconv_s1_kernel, K=K, pad=pad, H=H, W=W, Ho=Ho, Wo=Wo,
            Cin=Cin, Cout=Cout, NB=NB, WoCo_pad=WoCo_pad,
            residual=residual, mxu_dtype=mxu_dtype)

        def full(shape):
            return pl.BlockSpec(shape, lambda b, _r=len(shape): (0,) * _r)

        # honest VMEM estimate: 2 buffers x block bytes, actual dtypes
        vmem_est = 2 * (NB * Hp * WpC * csize          # input blocks
                        + NB * Ho * WoCo_pad * xsize   # output blocks
                        + K * K * WoC * csize          # depthwise weights
                        + (WoC + WoCo_pad) * 4         # biases
                        + 2 * Cin * Cr * 4             # SE weights
                        + 2 * WoC * Cin * csize        # ssum + sexp
                        + WoC * WoCo_pad * csize)      # g0
        vmem_limit = int(min(vmem_budget,
                             max(vmem_est * 5 // 4 + (4 << 20), 16 << 20)))

        flops = Npad * (2 * Ho * WoC * K * K
                        + 2 * Ho * WoC * WoCo_pad
                        + 4 * (WoC * Cin + Cin * Cr)
                        + 8 * Ho * WoC)
        transc = Npad * (Ho * WoC + Cin + Cr)
        bytes_acc = (Npad * (Hp * WpC * csize + Ho * WoCo_pad * xsize)
                     + K * K * WoC * csize + WoC * WoCo_pad * csize
                     + 2 * WoC * Cin * csize
                     + (WoC + WoCo_pad) * 4 + 2 * Cin * Cr * 4)

        out = pl.pallas_call(
            kernel_fn,
            out_shape=jax.ShapeDtypeStruct((Npad, Ho, WoCo_pad), x.dtype),
            grid_spec=pltpu.PrefetchScalarGridSpec(
                num_scalar_prefetch=0,
                grid=(Ngrid,),
                in_specs=[
                    pl.BlockSpec((NB, Hp, WpC), lambda b: (b, 0, 0)),
                    full((K, K, 1, WoC)),     # depthwise weights (tiled, folded)
                    full((1, WoC)),           # BN1 bias (tiled)
                    full((Cin, Cr)),          # SE fc1
                    full((Cr, Cin)),          # SE fc2
                    full((WoC, Cin)),         # channel-sum matrix
                    full((Cin, WoC)),         # channel-expand matrix
                    full((WoC, WoCo_pad)),    # block-diag 1x1 weights (folded)
                    full((1, WoCo_pad)),      # folded conv bias + BN2 bias
                ],
                out_specs=pl.BlockSpec((NB, Ho, WoCo_pad), lambda b: (b, 0, 0)),
            ),
            compiler_params=pltpu.CompilerParams(
                dimension_semantics=("parallel",),
                vmem_limit_bytes=vmem_limit),
            cost_estimate=pl.CostEstimate(
                flops=int(flops), transcendentals=int(transc),
                bytes_accessed=int(bytes_acc)),
        )(xpf, w_dw_t, b1_t, params["w_se1"], params["w_se2"],
          ssum, sexp, g0, b2_t)

        out = out[:N, :, :WoCo].reshape(N, Ho, Wo, Cout)
        return jnp.transpose(out, (0, 3, 1, 2))                # back to NCHW

    # ---------------- generic fallback path ----------------
    Cout_pad = _round_up(Cout, 128)          # lane-dense stores in the fallback
    xp_c = xp.astype(const_dtype)
    w_dw_c = w_dw.reshape(K, K, 1, Cin).astype(const_dtype)
    w_pw_p = jnp.pad(w_pw, ((0, 0), (0, Cout_pad - Cout))).astype(const_dtype)
    b_out_p = jnp.pad(b_out, (0, Cout_pad - Cout)).reshape(1, Cout_pad)

    kernel_fn = functools.partial(
        _mbconv_generic_kernel, K=K, stride=stride, pad=pad, H=H, W=W,
        Ho=Ho, Wo=Wo, Cin=Cin, Cout_pad=Cout_pad, residual=residual,
        mxu_dtype=mxu_dtype)

    def full(shape):
        return pl.BlockSpec(shape, lambda n, _r=len(shape): (0,) * _r)

    vmem_est = 2 * (Hp * Wp * Cin * csize + Ho * Wo * Cout_pad * xsize
                    + K * K * Cin * csize + Cin * 4
                    + 2 * Cin * Cr * 4 + Cin * Cout_pad * csize + Cout_pad * 4)
    vmem_limit = int(min(vmem_budget,
                         max(vmem_est * 5 // 4 + (4 << 20), 16 << 20)))
    flops = N * (2 * Ho * Wo * Cin * K * K + 2 * Ho * Wo * Cin * Cout_pad
                 + 4 * Cin * Cr + 8 * Ho * Wo * Cin)
    transc = N * (Ho * Wo * Cin + Cin + Cr)
    bytes_acc = (N * (Hp * Wp * Cin * csize + Ho * Wo * Cout_pad * xsize)
                 + K * K * Cin * csize + Cin * Cout_pad * csize
                 + Cin * 4 + Cout_pad * 4 + 2 * Cin * Cr * 4)

    out = pl.pallas_call(
        kernel_fn,
        out_shape=jax.ShapeDtypeStruct((N, Ho * Wo, Cout_pad), x.dtype),
        grid_spec=pltpu.PrefetchScalarGridSpec(
            num_scalar_prefetch=0,
            grid=(N,),
            in_specs=[
                pl.BlockSpec((1, Hp, Wp, Cin), lambda n: (n, 0, 0, 0)),
                full((K, K, 1, Cin)),
                full((1, 1, Cin)),
                full((Cin, Cr)),
                full((Cr, Cin)),
                full((Cin, Cout_pad)),
                full((1, Cout_pad)),
            ],
            out_specs=pl.BlockSpec((1, Ho * Wo, Cout_pad), lambda n: (n, 0, 0)),
        ),
        compiler_params=pltpu.CompilerParams(
            dimension_semantics=("parallel",),
            vmem_limit_bytes=vmem_limit),
        cost_estimate=pl.CostEstimate(
            flops=int(flops), transcendentals=int(transc),
            bytes_accessed=int(bytes_acc)),
    )(xp_c, w_dw_c, bias1.reshape(1, 1, Cin),
      params["w_se1"], params["w_se2"], w_pw_p, b_out_p)

    out = out[:, :, :Cout].reshape(N, Ho, Wo, Cout)
    return jnp.transpose(out, (0, 3, 1, 2))


# ---------------------------------------------------------------------------
# pure-JAX reference (NCHW), same math as the PyTorch module in eval mode
# ---------------------------------------------------------------------------
def mbconv1_reference(x, p, *, kernel, stride, padding):
    N, Cin, H, W = x.shape
    Cout = p["w_pw"].shape[1]
    hi = jax.lax.Precision.HIGHEST
    w_dw_oihw = jnp.transpose(p["w_dw"], (2, 0, 1))[:, None, :, :]  # (Cin,1,K,K)
    y = lax.conv_general_dilated(
        x, w_dw_oihw, window_strides=(stride, stride),
        padding=[(padding, padding), (padding, padding)],
        feature_group_count=Cin,
        dimension_numbers=("NCHW", "OIHW", "NCHW"), precision=hi)
    y = y * p["scale1"].reshape(1, Cin, 1, 1) + p["bias1"].reshape(1, Cin, 1, 1)
    y = y * jax.nn.sigmoid(y)
    pooled = y.mean(axis=(2, 3))
    h = jnp.dot(pooled, p["w_se1"], precision=hi)
    h = h * jax.nn.sigmoid(h)
    e = jax.nn.sigmoid(jnp.dot(h, p["w_se2"], precision=hi))
    y = y * e[:, :, None, None]
    out = jnp.einsum("nchw,co->nohw", y, p["w_pw"], precision=hi)
    out = out + p["b_pw"].reshape(1, Cout, 1, 1)
    out = out * p["scale2"].reshape(1, Cout, 1, 1) + p["bias2"].reshape(1, Cout, 1, 1)
    if Cin == Cout and stride == 1:
        out = out + x
    return out


def _make_params(key, Cin, Cout, K, ratio):
    Cr = Cin // ratio
    eps = 1e-5
    ks = jax.random.split(key, 14)
    w_dw = 0.2 * jax.random.normal(ks[0], (K, K, Cin), jnp.float32)
    gamma1 = 1.0 + 0.1 * jax.random.normal(ks[1], (Cin,), jnp.float32)
    beta1 = 0.1 * jax.random.normal(ks[2], (Cin,), jnp.float32)
    mean1 = 0.1 * jax.random.normal(ks[3], (Cin,), jnp.float32)
    var1 = 1.0 + 0.5 * jax.random.uniform(ks[4], (Cin,), jnp.float32)
    scale1 = gamma1 / jnp.sqrt(var1 + eps)
    bias1 = beta1 - mean1 * scale1
    w_se1 = 0.3 * jax.random.normal(ks[5], (Cin, Cr), jnp.float32)
    w_se2 = 0.3 * jax.random.normal(ks[6], (Cr, Cin), jnp.float32)
    w_pw = 0.2 * jax.random.normal(ks[7], (Cin, Cout), jnp.float32)
    b_pw = 0.05 * jax.random.normal(ks[8], (Cout,), jnp.float32)
    gamma2 = 1.0 + 0.1 * jax.random.normal(ks[9], (Cout,), jnp.float32)
    beta2 = 0.1 * jax.random.normal(ks[10], (Cout,), jnp.float32)
    mean2 = 0.1 * jax.random.normal(ks[11], (Cout,), jnp.float32)
    var2 = 1.0 + 0.5 * jax.random.uniform(ks[12], (Cout,), jnp.float32)
    scale2 = gamma2 / jnp.sqrt(var2 + eps)
    bias2 = beta2 - mean2 * scale2
    return {
        "w_dw": w_dw, "scale1": scale1, "bias1": bias1,
        "w_se1": w_se1, "w_se2": w_se2,
        "w_pw": w_pw, "b_pw": b_pw, "scale2": scale2, "bias2": bias2,
    }


if __name__ == "__main__":
    key = jax.random.PRNGKey(0)
    kx, kp1, kp2 = jax.random.split(key, 3)

    N, Cin, H, W = 2, 8, 16, 16
    K, padding, ratio = 3, 1, 4
    x = jax.random.normal(kx, (N, Cin, H, W), jnp.float32)

    # (tag, Cout, param key, mxu dtype, stride, tolerance)
    #  - bf16 paths use the loose 2e-2 tolerance (quantized MXU inputs)
    #  - the f32 config exercises the exact same indexing with tight tolerance
    configs = [
        ("residual-bf16", 8, kp1, jnp.bfloat16, 1, 2e-2),
        ("project-bf16", 16, kp2, jnp.bfloat16, 1, 2e-2),
        ("residual-f32", 8, kp1, jnp.float32, 1, 1e-4),
        ("stride2-bf16", 16, kp2, jnp.bfloat16, 2, 2e-2),
    ]

    for tag, Cout, kp, mdt, stride, tol in configs:
        params = _make_params(kp, Cin, Cout, K, ratio)
        out = mbconv1_forward(x, params, kernel=K, stride=stride,
                              padding=padding, mxu_dtype=mdt)
        out = jax.block_until_ready(out)
        ref = mbconv1_reference(x, params, kernel=K, stride=stride,
                                padding=padding)
        assert out.shape == ref.shape, (tag, out.shape, ref.shape)
        err = float(jnp.max(jnp.abs(out - ref)))
        assert jnp.allclose(out, ref, rtol=tol, atol=tol), (tag, err)

    print("KERNEL_OK")
</pallas_src>

<mosaic_0001>
module attributes {stable_mosaic.version = 11 : i64} {
  func.func @_mbconv_s1_kernel(%arg0: i32, %arg1: memref<1x18x144xbf16, #tpu.memory_space<vmem>>, %arg2: memref<3x3x1x128xbf16, #tpu.memory_space<vmem>>, %arg3: memref<1x128xf32, #tpu.memory_space<vmem>>, %arg4: memref<8x2xf32, #tpu.memory_space<vmem>>, %arg5: memref<2x8xf32, #tpu.memory_space<vmem>>, %arg6: memref<128x8xbf16, #tpu.memory_space<vmem>>, %arg7: memref<8x128xbf16, #tpu.memory_space<vmem>>, %arg8: memref<128x128xbf16, #tpu.memory_space<vmem>>, %arg9: memref<1x128xf32, #tpu.memory_space<vmem>>, %arg10: memref<1x16x128xf32, #tpu.memory_space<vmem>>) attributes {dimension_semantics = [#tpu.dimension_semantics<parallel>], iteration_bounds = array<i64: 2>, scalar_prefetch = 0 : i64, scratch_operands = 0 : i64, tpu.core_type = #tpu.core_type<tc>, window_params = [{transform_indices = @transform_0, window_bounds = array<i64: 1, 18, 144>}, {pipeline_mode = #tpu.pipeline_mode<synchronous>, transform_indices = @transform_1, window_bounds = array<i64: 3, 3, 1, 128>}, {pipeline_mode = #tpu.pipeline_mode<synchronous>, transform_indices = @transform_2, window_bounds = array<i64: 1, 128>}, {pipeline_mode = #tpu.pipeline_mode<synchronous>, transform_indices = @transform_3, window_bounds = array<i64: 8, 2>}, {pipeline_mode = #tpu.pipeline_mode<synchronous>, transform_indices = @transform_4, window_bounds = array<i64: 2, 8>}, {pipeline_mode = #tpu.pipeline_mode<synchronous>, transform_indices = @transform_5, window_bounds = array<i64: 128, 8>}, {pipeline_mode = #tpu.pipeline_mode<synchronous>, transform_indices = @transform_6, window_bounds = array<i64: 8, 128>}, {pipeline_mode = #tpu.pipeline_mode<synchronous>, transform_indices = @transform_7, window_bounds = array<i64: 128, 128>}, {pipeline_mode = #tpu.pipeline_mode<synchronous>, transform_indices = @transform_8, window_bounds = array<i64: 1, 128>}, {transform_indices = @transform_9, window_bounds = array<i64: 1, 16, 128>}]} {
    %c0 = arith.constant 0 : index
    %c0_0 = arith.constant 0 : index
    %c0_1 = arith.constant 0 : index
    %c0_2 = arith.constant 0 : index
    %0 = vector.load %arg2[%c0, %c0_0, %c0_1, %c0_2] : memref<3x3x1x128xbf16, #tpu.memory_space<vmem>>, vector<3x3x1x128xbf16>
    %1 = arith.extf %0 : vector<3x3x1x128xbf16> to vector<3x3x1x128xf32>
    %c0_3 = arith.constant 0 : index
    %c0_4 = arith.constant 0 : index
    %2 = vector.load %arg3[%c0_3, %c0_4] : memref<1x128xf32, #tpu.memory_space<vmem>>, vector<1x128xf32>
    %c0_5 = arith.constant 0 : index
    %c0_6 = arith.constant 0 : index
    %3 = vector.load %arg4[%c0_5, %c0_6] : memref<8x2xf32, #tpu.memory_space<vmem>>, vector<8x2xf32>
    %c0_7 = arith.constant 0 : index
    %c0_8 = arith.constant 0 : index
    %4 = vector.load %arg5[%c0_7, %c0_8] : memref<2x8xf32, #tpu.memory_space<vmem>>, vector<2x8xf32>
    %c0_9 = arith.constant 0 : index
    %c0_10 = arith.constant 0 : index
    %5 = vector.load %arg6[%c0_9, %c0_10] : memref<128x8xbf16, #tpu.memory_space<vmem>>, vector<128x8xbf16>
    %6 = arith.extf %5 : vector<128x8xbf16> to vector<128x8xf32>
    %c0_11 = arith.constant 0 : index
    %c0_12 = arith.constant 0 : index
    %7 = vector.load %arg7[%c0_11, %c0_12] : memref<8x128xbf16, #tpu.memory_space<vmem>>, vector<8x128xbf16>
    %8 = arith.extf %7 : vector<8x128xbf16> to vector<8x128xf32>
    %c0_13 = arith.constant 0 : index
    %c0_14 = arith.constant 0 : index
    %9 = vector.load %arg8[%c0_13, %c0_14] : memref<128x128xbf16, #tpu.memory_space<vmem>>, vector<128x128xbf16>
    %c0_15 = arith.constant 0 : index
    %c0_16 = arith.constant 0 : index
    %10 = vector.load %arg9[%c0_15, %c0_16] : memref<1x128xf32, #tpu.memory_space<vmem>>, vector<1x128xf32>
    %c0_i32 = arith.constant 0 : i32
    %11 = arith.index_cast %c0_i32 : i32 to index
    %c0_17 = arith.constant 0 : index
    %c0_18 = arith.constant 0 : index
    %12 = vector.load %arg1[%11, %c0_17, %c0_18] : memref<1x18x144xbf16, #tpu.memory_space<vmem>>, vector<1x18x144xbf16>
    %13 = vector.shape_cast %12 : vector<1x18x144xbf16> to vector<18x144xbf16>
    %14 = arith.extf %13 : vector<18x144xbf16> to vector<18x144xf32>
    %15 = vector.extract_strided_slice %14 {offsets = [0, 0], sizes = [16, 128], strides = [1, 1]} : vector<18x144xf32> to vector<16x128xf32>
    %16 = vector.extract_strided_slice %1 {offsets = [0, 0, 0, 0], sizes = [1, 1, 1, 128], strides = [1, 1, 1, 1]} : vector<3x3x1x128xf32> to vector<1x1x1x128xf32>
    %17 = vector.shape_cast %16 : vector<1x1x1x128xf32> to vector<1x128xf32>
    %18 = vector.broadcast %17 : vector<1x128xf32> to vector<16x128xf32>
    %19 = arith.mulf %15, %18 : vector<16x128xf32>
    %20 = vector.extract_strided_slice %14 {offsets = [0, 8], sizes = [16, 128], strides = [1, 1]} : vector<18x144xf32> to vector<16x128xf32>
    %21 = vector.extract_strided_slice %1 {offsets = [0, 1, 0, 0], sizes = [1, 1, 1, 128], strides = [1, 1, 1, 1]} : vector<3x3x1x128xf32> to vector<1x1x1x128xf32>
    %22 = vector.shape_cast %21 : vector<1x1x1x128xf32> to vector<1x128xf32>
    %23 = vector.broadcast %22 : vector<1x128xf32> to vector<16x128xf32>
    %24 = arith.mulf %20, %23 : vector<16x128xf32>
    %25 = arith.addf %19, %24 : vector<16x128xf32>
    %26 = vector.extract_strided_slice %14 {offsets = [0, 16], sizes = [16, 128], strides = [1, 1]} : vector<18x144xf32> to vector<16x128xf32>
    %27 = vector.extract_strided_slice %1 {offsets = [0, 2, 0, 0], sizes = [1, 1, 1, 128], strides = [1, 1, 1, 1]} : vector<3x3x1x128xf32> to vector<1x1x1x128xf32>
    %28 = vector.shape_cast %27 : vector<1x1x1x128xf32> to vector<1x128xf32>
    %29 = vector.broadcast %28 : vector<1x128xf32> to vector<16x128xf32>
    %30 = arith.mulf %26, %29 : vector<16x128xf32>
    %31 = arith.addf %25, %30 : vector<16x128xf32>
    %32 = vector.extract_strided_slice %14 {offsets = [1, 0], sizes = [16, 128], strides = [1, 1]} : vector<18x144xf32> to vector<16x128xf32>
    %33 = vector.extract_strided_slice %1 {offsets = [1, 0, 0, 0], sizes = [1, 1, 1, 128], strides = [1, 1, 1, 1]} : vector<3x3x1x128xf32> to vector<1x1x1x128xf32>
    %34 = vector.shape_cast %33 : vector<1x1x1x128xf32> to vector<1x128xf32>
    %35 = vector.broadcast %34 : vector<1x128xf32> to vector<16x128xf32>
    %36 = arith.mulf %32, %35 : vector<16x128xf32>
    %37 = arith.addf %31, %36 : vector<16x128xf32>
    %38 = vector.extract_strided_slice %14 {offsets = [1, 8], sizes = [16, 128], strides = [1, 1]} : vector<18x144xf32> to vector<16x128xf32>
    %39 = vector.extract_strided_slice %1 {offsets = [1, 1, 0, 0], sizes = [1, 1, 1, 128], strides = [1, 1, 1, 1]} : vector<3x3x1x128xf32> to vector<1x1x1x128xf32>
    %40 = vector.shape_cast %39 : vector<1x1x1x128xf32> to vector<1x128xf32>
    %41 = vector.broadcast %40 : vector<1x128xf32> to vector<16x128xf32>
    %42 = arith.mulf %38, %41 : vector<16x128xf32>
    %43 = arith.addf %37, %42 : vector<16x128xf32>
    %44 = vector.extract_strided_slice %14 {offsets = [1, 16], sizes = [16, 128], strides = [1, 1]} : vector<18x144xf32> to vector<16x128xf32>
    %45 = vector.extract_strided_slice %1 {offsets = [1, 2, 0, 0], sizes = [1, 1, 1, 128], strides = [1, 1, 1, 1]} : vector<3x3x1x128xf32> to vector<1x1x1x128xf32>
    %46 = vector.shape_cast %45 : vector<1x1x1x128xf32> to vector<1x128xf32>
    %47 = vector.broadcast %46 : vector<1x128xf32> to vector<16x128xf32>
    %48 = arith.mulf %44, %47 : vector<16x128xf32>
    %49 = arith.addf %43, %48 : vector<16x128xf32>
    %50 = vector.extract_strided_slice %14 {offsets = [2, 0], sizes = [16, 128], strides = [1, 1]} : vector<18x144xf32> to vector<16x128xf32>
    %51 = vector.extract_strided_slice %1 {offsets = [2, 0, 0, 0], sizes = [1, 1, 1, 128], strides = [1, 1, 1, 1]} : vector<3x3x1x128xf32> to vector<1x1x1x128xf32>
    %52 = vector.shape_cast %51 : vector<1x1x1x128xf32> to vector<1x128xf32>
    %53 = vector.broadcast %52 : vector<1x128xf32> to vector<16x128xf32>
    %54 = arith.mulf %50, %53 : vector<16x128xf32>
    %55 = arith.addf %49, %54 : vector<16x128xf32>
    %56 = vector.extract_strided_slice %14 {offsets = [2, 8], sizes = [16, 128], strides = [1, 1]} : vector<18x144xf32> to vector<16x128xf32>
    %57 = vector.extract_strided_slice %1 {offsets = [2, 1, 0, 0], sizes = [1, 1, 1, 128], strides = [1, 1, 1, 1]} : vector<3x3x1x128xf32> to vector<1x1x1x128xf32>
    %58 = vector.shape_cast %57 : vector<1x1x1x128xf32> to vector<1x128xf32>
    %59 = vector.broadcast %58 : vector<1x128xf32> to vector<16x128xf32>
    %60 = arith.mulf %56, %59 : vector<16x128xf32>
    %61 = arith.addf %55, %60 : vector<16x128xf32>
    %62 = vector.extract_strided_slice %14 {offsets = [2, 16], sizes = [16, 128], strides = [1, 1]} : vector<18x144xf32> to vector<16x128xf32>
    %63 = vector.extract_strided_slice %1 {offsets = [2, 2, 0, 0], sizes = [1, 1, 1, 128], strides = [1, 1, 1, 1]} : vector<3x3x1x128xf32> to vector<1x1x1x128xf32>
    %64 = vector.shape_cast %63 : vector<1x1x1x128xf32> to vector<1x128xf32>
    %65 = vector.broadcast %64 : vector<1x128xf32> to vector<16x128xf32>
    %66 = arith.mulf %62, %65 : vector<16x128xf32>
    %67 = arith.addf %61, %66 : vector<16x128xf32>
    %68 = vector.broadcast %2 : vector<1x128xf32> to vector<16x128xf32>
    %69 = arith.addf %67, %68 : vector<16x128xf32>
    %70 = arith.negf %69 : vector<16x128xf32>
    %71 = math.exp %70 : vector<16x128xf32>
    %cst = arith.constant 1.000000e+00 : f32
    %72 = vector.broadcast %cst : f32 to vector<16x128xf32>
    %73 = arith.addf %72, %71 : vector<16x128xf32>
    %74 = arith.divf %72, %73 : vector<16x128xf32>
    %75 = arith.mulf %69, %74 : vector<16x128xf32>
    %cst_19 = arith.constant dense<0.000000e+00> : vector<128xf32>
    %76 = vector.multi_reduction <add>, %75, %cst_19 [0] : vector<16x128xf32> to vector<128xf32>
    %77 = vector.shape_cast %76 : vector<128xf32> to vector<1x128xf32>
    %cst_20 = arith.constant dense<0.000000e+00> : vector<1x8xf32>
    %78 = tpu.matmul %77, %6, %cst_20 {dimension_numbers = #tpu.dot_dimension_numbers<[1], [0], [0], [1], [0, 0, 1, 1], [], []>} : vector<1x128xf32>, vector<128x8xf32>, vector<1x8xf32> -> vector<1x8xf32>
    %cst_21 = arith.constant 3.906250e-03 : f32
    %79 = vector.broadcast %cst_21 : f32 to vector<1x8xf32>
    %80 = arith.mulf %78, %79 : vector<1x8xf32>
    %cst_22 = arith.constant dense<0.000000e+00> : vector<1x2xf32>
    %81 = tpu.matmul %80, %3, %cst_22 {dimension_numbers = #tpu.dot_dimension_numbers<[1], [0], [0], [1], [0, 0, 1, 1], [], []>} : vector<1x8xf32>, vector<8x2xf32>, vector<1x2xf32> -> vector<1x2xf32>
    %82 = arith.negf %81 : vector<1x2xf32>
    %83 = math.exp %82 : vector<1x2xf32>
    %cst_23 = arith.constant 1.000000e+00 : f32
    %84 = vector.broadcast %cst_23 : f32 to vector<1x2xf32>
    %85 = arith.addf %84, %83 : vector<1x2xf32>
    %86 = arith.divf %84, %85 : vector<1x2xf32>
    %87 = arith.mulf %81, %86 : vector<1x2xf32>
    %cst_24 = arith.constant dense<0.000000e+00> : vector<1x8xf32>
    %88 = tpu.matmul %87, %4, %cst_24 {dimension_numbers = #tpu.dot_dimension_numbers<[1], [0], [0], [1], [0, 0, 1, 1], [], []>} : vector<1x2xf32>, vector<2x8xf32>, vector<1x8xf32> -> vector<1x8xf32>
    %89 = arith.negf %88 : vector<1x8xf32>
    %90 = math.exp %89 : vector<1x8xf32>
    %cst_25 = arith.constant 1.000000e+00 : f32
    %91 = vector.broadcast %cst_25 : f32 to vector<1x8xf32>
    %92 = arith.addf %91, %90 : vector<1x8xf32>
    %93 = arith.divf %91, %92 : vector<1x8xf32>
    %cst_26 = arith.constant dense<0.000000e+00> : vector<1x128xf32>
    %94 = tpu.matmul %93, %8, %cst_26 {dimension_numbers = #tpu.dot_dimension_numbers<[1], [0], [0], [1], [0, 0, 1, 1], [], []>} : vector<1x8xf32>, vector<8x128xf32>, vector<1x128xf32> -> vector<1x128xf32>
    %95 = vector.broadcast %94 : vector<1x128xf32> to vector<16x128xf32>
    %96 = arith.mulf %75, %95 : vector<16x128xf32>
    %97 = arith.truncf %96 : vector<16x128xf32> to vector<16x128xbf16>
    %cst_27 = arith.constant dense<0.000000e+00> : vector<16x128xf32>
    %98 = tpu.matmul %97, %9, %cst_27 {dimension_numbers = #tpu.dot_dimension_numbers<[1], [0], [0], [1], [0, 0, 1, 1], [], []>} : vector<16x128xbf16>, vector<128x128xbf16>, vector<16x128xf32> -> vector<16x128xf32>
    %99 = vector.broadcast %10 : vector<1x128xf32> to vector<16x128xf32>
    %100 = arith.addf %98, %99 : vector<16x128xf32>
    %101 = vector.extract_strided_slice %14 {offsets = [1, 8], sizes = [16, 128], strides = [1, 1]} : vector<18x144xf32> to vector<16x128xf32>
    %102 = arith.addf %100, %101 : vector<16x128xf32>
    %103 = arith.index_cast %c0_i32 : i32 to index
    %c0_28 = arith.constant 0 : index
    %c0_29 = arith.constant 0 : index
    %104 = vector.load %arg10[%103, %c0_28, %c0_29] : memref<1x16x128xf32, #tpu.memory_space<vmem>>, vector<1x16x128xf32>
    %105 = vector.shape_cast %104 : vector<1x16x128xf32> to vector<16x128xf32>
    %106 = vector.shape_cast %102 : vector<16x128xf32> to vector<1x16x128xf32>
    tpu.vector_store %arg10[%103, %c0_28, %c0_29], %106 {strides = array<i32>} : memref<1x16x128xf32, #tpu.memory_space<vmem>>, vector<1x16x128xf32>,
    %c1_i32 = arith.constant 1 : i32
    return
  }
  func.func @transform_0(%arg0: i32) -> (i32, i32, i32) {
    %c0_i32 = arith.constant 0 : i32
    %c0_i32_0 = arith.constant 0 : i32
    %c0_i32_1 = arith.constant 0 : i32
    return %arg0, %c0_i32, %c0_i32_0 : i32, i32, i32
  }
  func.func @transform_1(%arg0: i32) -> (i32, i32, i32, i32) {
    %c0_i32 = arith.constant 0 : i32
    %c0_i32_0 = arith.constant 0 : i32
    %c0_i32_1 = arith.constant 0 : i32
    %c0_i32_2 = arith.constant 0 : i32
    %c0_i32_3 = arith.constant 0 : i32
    return %c0_i32, %c0_i32_0, %c0_i32_1, %c0_i32_2 : i32, i32, i32, i32
  }
  func.func @transform_2(%arg0: i32) -> (i32, i32) {
    %c0_i32 = arith.constant 0 : i32
    %c0_i32_0 = arith.constant 0 : i32
    %c0_i32_1 = arith.constant 0 : i32
    return %c0_i32, %c0_i32_0 : i32, i32
  }
  func.func @transform_3(%arg0: i32) -> (i32, i32) {
    %c0_i32 = arith.constant 0 : i32
    %c0_i32_0 = arith.constant 0 : i32
    %c0_i32_1 = arith.constant 0 : i32
    return %c0_i32, %c0_i32_0 : i32, i32
  }
  func.func @transform_4(%arg0: i32) -> (i32, i32) {
    %c0_i32 = arith.constant 0 : i32
    %c0_i32_0 = arith.constant 0 : i32
    %c0_i32_1 = arith.constant 0 : i32
    return %c0_i32, %c0_i32_0 : i32, i32
  }
  func.func @transform_5(%arg0: i32) -> (i32, i32) {
    %c0_i32 = arith.constant 0 : i32
    %c0_i32_0 = arith.constant 0 : i32
    %c0_i32_1 = arith.constant 0 : i32
    return %c0_i32, %c0_i32_0 : i32, i32
  }
  func.func @transform_6(%arg0: i32) -> (i32, i32) {
    %c0_i32 = arith.constant 0 : i32
    %c0_i32_0 = arith.constant 0 : i32
    %c0_i32_1 = arith.constant 0 : i32
    return %c0_i32, %c0_i32_0 : i32, i32
  }
  func.func @transform_7(%arg0: i32) -> (i32, i32) {
    %c0_i32 = arith.constant 0 : i32
    %c0_i32_0 = arith.constant 0 : i32
    %c0_i32_1 = arith.constant 0 : i32
    return %c0_i32, %c0_i32_0 : i32, i32
  }
  func.func @transform_8(%arg0: i32) -> (i32, i32) {
    %c0_i32 = arith.constant 0 : i32
    %c0_i32_0 = arith.constant 0 : i32
    %c0_i32_1 = arith.constant 0 : i32
    return %c0_i32, %c0_i32_0 : i32, i32
  }
  func.func @transform_9(%arg0: i32) -> (i32, i32, i32) {
    %c0_i32 = arith.constant 0 : i32
    %c0_i32_0 = arith.constant 0 : i32
    %c0_i32_1 = arith.constant 0 : i32
    return %arg0, %c0_i32, %c0_i32_0 : i32, i32, i32
  }
}

</mosaic_0001>

<bundles_post_ra>
// kernel: tpu_custom_call.1
= control target key start
LH: loop header
LB: loop body
LE: loop exit
PB: predicated region body
PF: predicated region fallthrough
CT: control target
= control target key end

     0   :  { %14 = vsyncpa [#allocation3], 0  ;;  %s1650_s0 = inlined_call_operand.vmem [shape: bf16[2,18,144], index: 0, kind: input, shape index: {}]   ;;  %s1651_s1 = inlined_call_operand.vmem [shape: bf16[3,3,1,128], index: 1, kind: input, shape index: {}]   ;;  %s1652_s2 = inlined_call_operand.vmem [shape: f32[1,128], index: 2, kind: input, shape index: {}]   ;;  %s1653_s3 = inlined_call_operand.vmem [shape: f32[8,2], index: 3, kind: input, shape index: {}]   ;;  %s1654_s4 = inlined_call_operand.vmem [shape: f32[2,8], index: 4, kind: input, shape index: {}]   ;;  %s1655_s5 = inlined_call_operand.vmem [shape: bf16[128,8], index: 5, kind: input, shape index: {}]   ;;  %s1656_s6 = inlined_call_operand.vmem [shape: bf16[8,128], index: 6, kind: input, shape index: {}]   ;;  %s1657_s7 = inlined_call_operand.vmem [shape: bf16[128,128], index: 7, kind: input, shape index: {}]   ;;  %s1658_s8 = inlined_call_operand.vmem [shape: f32[1,128], index: 8, kind: input, shape index: {}]   ;;  %s1659_s9 = inlined_call_operand.hbm [shape: f32[2,16,128], index: 9, kind: output, shape index: {}]  }
   0x1   :  { %16 = vsyncpa [#allocation3 + $0x1], 0  ;;  %s1336_s30 = smov 0   ;;  %s1338_s10 = smov 0  }
   0x2   :  { %s1340_s11 = smov 0   ;;  %s1342_s12 = smov 0  }
   0x3 LB: > { %s1357_s13 = sadd.s32 4294967295, %s1279_s12   ;;  %s1035_s14 = sadd.s32 4294967294, %s1279_s12   ;;  %s1279_s12 = sphi %s1342_s12, %s1667_s12   ;;  %s1275_s11 = sphi %s1340_s11, %s1666_s11   ;;  %s1271_s10 = sphi %s1338_s10, %s1665_s10   ;;  %s1267_s30 = sphi %s1336_s30, %s1664_s30  }
   0x4   : > { %s1361_s15 = sadd.s32 1, %s1279_s12   ;;  %s223_s16 = sadd.s32 1, %s1275_s11 }
   0x5   : > { %s220_s17 = ssub.s32 %s1279_s12, %s1361_s15  ;;  %p233_p0 = scmp.ne.s32.totalorder %s1275_s11, %s1271_s10 }
   0x6   : > { %p221_p1 = scmp.eq.s32.totalorder %s220_s17, 0  ;;  %p234_p2 = scmp.eq.s32.totalorder %s1357_s13, 1 }
   0x7   : > { %p239_p3 = scmp.ne.s32.totalorder %s1271_s10, %s1267_s30  ;;  %p240_p4 = scmp.eq.s32.totalorder %s1035_s14, 1 }
   0x8   : > { %s1372_s18 = scalar_select %p221_p1, %s1275_s11, %s223_s16  }
   0x9   : > { %p1374_p5 = por %p234_p2, %p233_p0  ;;  %p1378_p6 = por %p240_p4, %p239_p3 }
   0xa   : > { %p1038_p7 = scmp.ge.s32.totalorder %s1279_s12, 1  ;;  %p290_p8 = scmp.lt.s32.totalorder %s1279_s12, 3 }
   0xc   : > { %p291_p9 = pnand %p1038_p7, %p290_p8 }
   0xd   : > { %s1660_s21 = smov (!%p291_p9), 8   ;;  %s1282_s22 = smov (!%p291_p9), 16  }
   0xe   : > { %294 = sbr.rel (%p291_p9) target bundleno = 1095 (0x447), region = 56  ;;  %p326_p10 = scmp.lt.s32.totalorder (!%p291_p9), %s1357_s13, 1 }
   0xf   : > { %s1283_s28 = smov (!%p291_p9), 120   ;;  %s1284_s29 = smov (!%p291_p9), 112  }
  0x10   : > { %s323_s25 = sand.u32 (!%p291_p9), 1, %s1271_s10   ;;  %s1237_s16 = scalar_lea.hbm (!%p291_p9), %s1659_s9, 32 }
  0x13   : > { %v332_v0 = vld [vmem:[%s1651_s1 + $0x1] sm:$0x1]  ;;  %v335_v1 = vld [vmem:[%s1651_s1 + $0x4] sm:$0x1]  ;;  %v333_v4 = vld [vmem:[%s1651_s1 + $0x2] sm:$0x1] }
  0x14   : > { %v341_v2 = vunpack.c.l.bf16 %v332_v0  ;;  %v344_v3 = vunpack.c.l.bf16 %v335_v1  ;;  %v336_v5 = vld [vmem:[%s1651_s1 + $0x5] sm:$0x1]  ;;  %v338_v6 = vld [vmem:[%s1651_s1 + $0x7] sm:$0x1]  ;;  %v342_v10 = vunpack.c.l.bf16 %v333_v4  ;;  %v339_v12 = vld [vmem:[%s1651_s1 + $0x8] sm:$0x1] }
  0x15   : > { %v347_v7 = vunpack.c.l.bf16 %v338_v6  ;;  %v345_v11 = vunpack.c.l.bf16 %v336_v5  ;;  %v348_v15 = vunpack.c.l.bf16 %v339_v12  ;;  %s327_s23 = scalar_select %p326_p10, %s1357_s13, 1  ;;  %vm478_vm0 = vcmask 1046528  }
  0x16   : > { %v415_v8 = vperm.slane %v341_v2, 0  ;;  %v488_v9 = vperm.slane %v344_v3, 0  ;;  %v443_v16 = vperm.slane %v342_v10, 0  ;;  %vm577_vm1 = vcmask 1045504  }
  0x17   : > { %v587_v13 = vperm.slane %v347_v7, 0  ;;  %v529_v17 = vperm.slane %v345_v11, 0  ;;  %v628_v18 = vperm.slane %v348_v15, 0  ;;  %s1134_s24 = smul.u32 24, %s327_s23  ;;  %vm436_vm2 = vcmask 982016  }
  0x18   : > { %v1179_v14 = vpack.i.bf16 %v488_v9, %v415_v8  ;;  %vm464_vm3 = vcmask 916480   ;;  %vm742_vm12 = vcmask 64512   ;;  %vm790_vm13 = vcmask 1041408  }
  0x19   : > { %589 = vrot.lane.b32.xlu1 %v587_v13, %s1660_s21  ;;  %v1184_v19 = vpack.i.bf16 %v529_v17, %v443_v16  ;;  %s330_s27 = scalar_lea.vmem %s1650_s0, %s1134_s24 }
  0x1a   : > { %1180 = vrot.lane.b32.xlu0 %v1179_v14, %s1660_s21  ;;  %v404_v20 = vld [vmem:[%s330_s27 + $0x8] sm:$0xff]  ;;  %v403_v21 = vld [vmem:[%s330_s27] sm:$0xff]  ;;  %v405_v41 = vld [vmem:[%s330_s27 + $0x10] sm:$0x11] }
  0x1b   : > { %v1409_v22 = vunpack.c.h.bf16 %v404_v20  ;;  %v1411_v23 = vunpack.c.l.bf16 %v403_v21  ;;  %v1413_v24 = vunpack.c.l.bf16 %v404_v20  ;;  %v1421_v31 = vunpack.c.h.bf16 %v403_v21 }
  0x1c   : > { %v1433_v44 = vunpack.c.h.bf16 %v405_v41  ;;  %v1444_v57 = vunpack.c.l.bf16 %v405_v41 }
  0x21   : > { %630 = vrot.lane.b32.xlu1 %v628_v18, %s1282_s22 }
  0x22   : > { %1185 = vrot.lane.b32.xlu0 %v1184_v19, %s1282_s22 }
  0x8b   : > { %v590_v0 = vpop.permute.xlu1 %589 }
  0x8c   : > { %v1181_v25 = vpop.permute.xlu0 %1180  ;;  %v594_v6 = vmul.f32 %v590_v0, %v1413_v24  ;;  %v596_v7 = vmul.f32 %v590_v0, %v1444_v57  ;;  %v593_v8 = vmul.f32 %v590_v0, %v1421_v31  ;;  %v595_v9 = vmul.f32 %v590_v0, %v1409_v22 }
  0x8d   : > { %v1182_v26 = vunpack.i.l.bf16 %v1181_v25  ;;  %v1183_v30 = vunpack.i.h.bf16 %v1181_v25  ;;  %v597_v41 = vmul.f32 %v590_v0, %v1433_v44 }
  0x8e   : > { %v605_v13 = vrot.slane %v594_v6, 2  ;;  %v610_v14 = vrot.slane %v596_v7, 2  ;;  %v607_v16 = vrot.slane %v593_v8, 2  ;;  %v608_v17 = vrot.slane %v595_v9, 2  ;;  %v337_v6 = vld [vmem:[%s1651_s1 + $0x6] sm:$0x1] }
  0x8f   : > { %v423_v27 = vmul.f32 %v1182_v26, %v1409_v22  ;;  %v422_v28 = vmul.f32 %v1182_v26, %v1413_v24  ;;  %v420_v29 = vmul.f32 %v1182_v26, %v1411_v23  ;;  %v494_v36 = vmul.f32 %v1183_v30, %v1421_v31 }
  0x90   : > { %v496_v37 = vmul.f32 %v1183_v30, %v1409_v22  ;;  %v421_v38 = vmul.f32 %v1182_v26, %v1421_v31  ;;  %v493_v39 = vmul.f32 %v1183_v30, %v1411_v23  ;;  %v495_v40 = vmul.f32 %v1183_v30, %v1413_v24 }
  0x91   : > { %434 = vrot.lane.b32.xlu1 %v423_v27, %s1283_s28  ;;  %432 = vrot.lane.b32.xlu0 %v422_v28, %s1283_s28  ;;  %v508_v42 = vrot.slane %v494_v36, 1  ;;  %v498_v49 = vmul.f32 %v1183_v30, %v1433_v44  ;;  %v497_v1 = vmul.f32 %v1183_v30, %v1444_v57  ;;  %v611_v19 = vsel %vm577_vm1, %v605_v13, %v610_v14 }
  0x92   : > { %428 = vrot.lane.b32.xlu2 %v420_v29, %s1283_s28  ;;  %v509_v43 = vrot.slane %v496_v37, 1  ;;  %v505_v46 = vrot.slane %v493_v39, 1  ;;  %v506_v47 = vrot.slane %v495_v40, 1  ;;  %v609_v25 = vsel %vm577_vm1, %v607_v16, %v608_v17 }
  0x93   : > { %v513_v54 = vrot.slane %v498_v49, 1  ;;  %v511_v5 = vrot.slane %v497_v1, 1  ;;  %v631_v18 = vpop.permute.xlu1 %630  ;;  %v592_v30 = vmul.f32 %v590_v0, %v1411_v23 }
  0x94   : > { %v1186_v32 = vpop.permute.xlu0 %1185  ;;  %v510_v48 = vsel %vm478_vm0, %v508_v42, %v509_v43  ;;  %v507_v50 = vsel %vm478_vm0, %v505_v46, %v506_v47  ;;  %v634_v21 = vmul.f32 %v631_v18, %v1421_v31  ;;  %v636_v26 = vmul.f32 %v631_v18, %v1409_v22 }
  0x95   : > { %v1187_v33 = vunpack.i.l.bf16 %v1186_v32  ;;  %v1188_v45 = vunpack.i.h.bf16 %v1186_v32  ;;  %v514_v58 = vsel %vm478_vm0, %v509_v43, %v513_v54  ;;  %v512_v12 = vsel %vm478_vm0, %v506_v47, %v511_v5 }
  0x96   : > { %v633_v27 = vmul.f32 %v631_v18, %v1411_v23  ;;  %v635_v28 = vmul.f32 %v631_v18, %v1413_v24  ;;  %v648_v32 = vrot.slane %v634_v21, 2  ;;  %v604_v36 = vrot.slane %v592_v30, 2 }
  0x97   : > { %v450_v34 = vmul.f32 %v1187_v33, %v1413_v24  ;;  %v449_v35 = vmul.f32 %v1187_v33, %v1421_v31  ;;  %v448_v51 = vmul.f32 %v1187_v33, %v1411_v23  ;;  %v534_v52 = vmul.f32 %v1188_v45, %v1411_v23 }
  0x98   : > { %v536_v53 = vmul.f32 %v1188_v45, %v1413_v24  ;;  %v451_v59 = vmul.f32 %v1187_v33, %v1409_v22  ;;  %v537_v61 = vmul.f32 %v1188_v45, %v1409_v22  ;;  %v539_v62 = vmul.f32 %v1188_v45, %v1433_v44 }
  0x99   : > { %460 = vrot.lane.b32.xlu1 %v450_v34, %s1284_s29  ;;  %458 = vrot.lane.b32.xlu0 %v449_v35, %s1284_s29  ;;  %v546_v55 = vrot.slane %v534_v52, 1  ;;  %v538_v63 = vmul.f32 %v1188_v45, %v1444_v57  ;;  %v535_v15 = vmul.f32 %v1188_v45, %v1421_v31  ;;  %v649_v33 = vrot.slane %v636_v26, 2 }
  0x9a   : > { %430 = vrot.lane.b32.xlu2 %v421_v38, %s1283_s28  ;;  %v547_v56 = vrot.slane %v536_v53, 1  ;;  %v550_v2 = vrot.slane %v537_v61, 1  ;;  %v554_v3 = vrot.slane %v539_v62, 1  ;;  %v645_v34 = vrot.slane %v633_v27, 2  ;;  %v334_v61 = vld [vmem:[%s1651_s1 + $0x3] sm:$0x1] }
  0x9b   : > { %v552_v4 = vrot.slane %v538_v63, 1  ;;  %v549_v20 = vrot.slane %v535_v15, 1  ;;  %v646_v35 = vrot.slane %v635_v28, 2  ;;  %v650_v37 = vsel %vm577_vm1, %v648_v32, %v649_v33  ;;  %v331_v63 = vld [vmem:[%s1651_s1] sm:$0x1] }
  0x9c   : > { %v548_v60 = vsel %vm478_vm0, %v546_v55, %v547_v56  ;;  %v555_v10 = vsel %vm478_vm0, %v550_v2, %v554_v3  ;;  %v638_v39 = vmul.f32 %v631_v18, %v1433_v44  ;;  %v606_v40 = vsel %vm577_vm1, %v604_v36, %v605_v13 }
  0x9d   : > { %v553_v11 = vsel %vm478_vm0, %v547_v56, %v552_v4  ;;  %v551_v29 = vsel %vm478_vm0, %v549_v20, %v550_v2  ;;  %v647_v38 = vsel %vm577_vm1, %v645_v34, %v646_v35  ;;  %v612_v43 = vrot.slane %v597_v41, 2 }
  0x9e   : > { %v653_v42 = vrot.slane %v638_v39, 2  ;;  %v637_v47 = vmul.f32 %v631_v18, %v1444_v57  ;;  %v343_v0 = vunpack.c.l.bf16 %v334_v61  ;;  %v340_v1 = vunpack.c.l.bf16 %v331_v63 }
  0x9f   : > { %v613_v46 = vsel %vm577_vm1, %v608_v17, %v612_v43 }
  0xa0   : > { %v654_v45 = vsel %vm577_vm1, %v649_v33, %v653_v42  ;;  %v471_v2 = vperm.slane %v343_v0, 0  ;;  %v412_v3 = vperm.slane %v340_v1, 0  ;;  %v1199_v0 = vld [vmem:[%s1652_s2] ss:$0 sm:$0xff] }
  0xa1   : > { %517 = vrot.lane.b32.xlu1 %v510_v48, %s1283_s28  ;;  %515 = vrot.lane.b32.xlu0 %v507_v50, %s1283_s28  ;;  %v651_v48 = vrot.slane %v637_v47, 2 }
  0xa2   : > { %456 = vrot.lane.b32.xlu2 %v448_v51, %s1284_s29  ;;  %v473_v8 = vmul.f32 %v471_v2, %v1413_v24  ;;  %v472_v9 = vmul.f32 %v471_v2, %v1411_v23  ;;  %v474_v21 = vmul.f32 %v471_v2, %v1444_v57  ;;  %v414_v28 = vmul.f32 %v412_v3, %v1413_v24 }
  0xa3   : > { %v652_v49 = vsel %vm577_vm1, %v646_v35, %v651_v48 }
  0xa4   : > { %v480_v14 = vrot.slane %v473_v8, 1  ;;  %v479_v15 = vrot.slane %v472_v9, 1  ;;  %v482_v34 = vrot.slane %v474_v21, 1  ;;  %v1131_v9 = vld [vmem:[%s1655_s5 + $0x28] sm:$0xff]  }
  0xa9   : > { %556 = vrot.lane.b32.xlu1 %v548_v60, %s1284_s29  ;;  %521 = vrot.lane.b32.xlu0 %v514_v58, %s1283_s28 }
  0xaa   : > { %462 = vrot.lane.b32.xlu2 %v451_v59, %s1284_s29 }
  0xb1   : > { %562 = vrot.lane.b32.xlu1 %v555_v10, %s1284_s29  ;;  %560 = vrot.lane.b32.xlu0 %v553_v11, %s1284_s29  ;;  %v346_v10 = vunpack.c.l.bf16 %v337_v6  ;;  %v413_v11 = vmul.f32 %v412_v3, %v1411_v23 }
  0xb2   : > { %519 = vrot.lane.b32.xlu2 %v512_v12, %s1283_s28 }
  0xb3   : > { %v570_v16 = vperm.slane %v346_v10, 0 }
  0xb5   : > { %v572_v26 = vmul.f32 %v570_v16, %v1413_v24  ;;  %v571_v27 = vmul.f32 %v570_v16, %v1411_v23  ;;  %v573_v47 = vmul.f32 %v570_v16, %v1444_v57 }
  0xb9   : > { %618 = vrot.lane.b32.xlu1 %v611_v19, %s1283_s28  ;;  %616 = vrot.lane.b32.xlu0 %v609_v25, %s1283_s28  ;;  %v481_v25 = vsel %vm478_vm0, %v479_v15, %v480_v14 }
  0xba   : > { %558 = vrot.lane.b32.xlu2 %v551_v29, %s1284_s29 }
  0xc1   : > { %657 = vrot.lane.b32.xlu1 %v650_v37, %s1284_s29  ;;  %655 = vrot.lane.b32.xlu0 %v647_v38, %s1284_s29  ;;  %v579_v37 = vrot.slane %v572_v26, 2  ;;  %v578_v38 = vrot.slane %v571_v27, 2  ;;  %v1129_v26 = vld [vmem:[%s1655_s5 + $0x18] sm:$0xff]  }
  0xc2   : > { %614 = vrot.lane.b32.xlu2 %v606_v40, %s1283_s28  ;;  %v1110_v27 = vunpack.c.h.bf16 %v1129_v26 }
  0xc3   : > { %v580_v48 = vsel %vm577_vm1, %v578_v38, %v579_v37 }
  0xc9   : > { %661 = vrot.lane.b32.xlu0 %v654_v45, %s1284_s29 }
  0xca   : > { %620 = vrot.lane.b32.xlu2 %v613_v46, %s1283_s28  ;;  %v483_v46 = vsel %vm478_vm0, %v480_v14, %v482_v34  ;;  %v1117_v14 = vunpack.c.l.bf16 %v1131_v9 }
  0xd2   : > { %659 = vrot.lane.b32.xlu2 %v652_v49, %s1284_s29  ;;  %v1133_v49 = vld [vmem:[%s1655_s5 + $0x38] sm:$0xff]   ;;  %s1039_s29 = sshll.u32 %s323_s25, 4 }
  0xd3   : > { %s325_s14 = scalar_lea.vmem [#allocation2], %s1039_s29 }
  0xd4   : > { %s970_s23 = sshll.u32 %s325_s14, 4  ;;  %s971_s23 = int_to_ptr.vmem [resolvable:$true] %s970_s23 }
  0xec   : > { %v429_v50 = vpop.permute.xlu2 %428 }
  0xf4   : > { %v431_v51 = vpop.permute.xlu2 %430 }
  0xf5   : > { %v437_v12 = vsel %vm436_vm2, %v429_v50, %v431_v51 }
  0xf6   : > { %v441_v17 = vadd.f32 %v437_v12, %v413_v11  ;;  %v1118_v11 = vunpack.c.h.bf16 %v1131_v9 }
  0xfc   : > { %v457_v52 = vpop.permute.xlu2 %456 }
 0x103   : > { %v435_v53 = vpop.permute.xlu1 %434  ;;  %v433_v54 = vpop.permute.xlu0 %432 }
 0x104   : > { %v463_v55 = vpop.permute.xlu2 %462  ;;  %v438_v30 = vsel %vm436_vm2, %v433_v54, %v435_v53 }
 0x105   : > { %v442_v39 = vadd.f32 %v438_v30, %v414_v28  ;;  %v1109_v30 = vunpack.c.l.bf16 %v1129_v26 }
 0x10b   : > { %v461_v56 = vpop.permute.xlu1 %460  ;;  %v459_v58 = vpop.permute.xlu0 %458 }
 0x10c   : > { %v520_v59 = vpop.permute.xlu2 %519  ;;  %v465_v13 = vsel %vm464_vm3, %v457_v52, %v459_v58  ;;  %v466_v35 = vsel %vm464_vm3, %v461_v56, %v463_v55  ;;  %v1126_v52 = vunpack.c.h.bf16 %v1133_v49  ;;  %v581_v58 = vrot.slane %v573_v47, 2 }
 0x10d   : > { %v469_v20 = vadd.f32 %v465_v13, %v441_v17  ;;  %v470_v43 = vadd.f32 %v466_v35, %v442_v39  ;;  %v1096_v39 = vld [vmem:[%s1655_s5] sm:$0xff]  }
 0x10e   : > { %721 = vmatpush.msra.mxu0 %v1126_v52  ;;  %v582_v6 = vsel %vm577_vm1, %v579_v37, %v581_v58  ;;  %v1097_v47 = vunpack.c.l.bf16 %v1096_v39 }
 0x10f   : > { %v486_v33 = vadd.f32 %v481_v25, %v469_v20  ;;  %v487_v53 = vadd.f32 %v483_v46, %v470_v43 }
 0x113   : > { %v518_v60 = vpop.permute.xlu1 %517  ;;  %v516_v62 = vpop.permute.xlu0 %515 }
 0x114   : > { %v559_v7 = vpop.permute.xlu2 %558  ;;  %v523_v32 = vsel %vm436_vm2, %v516_v62, %v518_v60  ;;  %v1125_v60 = vunpack.c.l.bf16 %v1133_v49 }
 0x115   : > { %v527_v40 = vadd.f32 %v523_v32, %v486_v33 }
 0x116   : > { %722 = vmatpush.msra.mxu0 %v1125_v60 }
 0x11b   : > { %v557_v4 = vpop.permute.xlu1 %556  ;;  %v522_v5 = vpop.permute.xlu0 %521 }
 0x11c   : > { %v615_v29 = vpop.permute.xlu2 %614  ;;  %v564_v36 = vsel %vm464_vm3, %v557_v4, %v559_v7  ;;  %v524_v50 = vsel %vm436_vm2, %v520_v59, %v522_v5  ;;  %v1132_v59 = vld [vmem:[%s1655_s5 + $0x30] sm:$0xff]  }
 0x11d   : > { %v568_v45 = vadd.f32 %v564_v36, %v527_v40  ;;  %v528_v61 = vadd.f32 %v524_v50, %v487_v53  ;;  %v1122_v3 = vunpack.c.h.bf16 %v1132_v59  ;;  %v1121_v7 = vunpack.c.l.bf16 %v1132_v59  ;;  %v1127_v36 = vld [vmem:[%s1655_s5 + $0x8] sm:$0xff]  }
 0x11e   : > { %v1102_v38 = vunpack.c.h.bf16 %v1127_v36  ;;  %v1101_v40 = vunpack.c.l.bf16 %v1127_v36 }
 0x11f   : > { %v585_v55 = vadd.f32 %v580_v48, %v568_v45  ;;  %723 = vmatpush.msra.mxu0 %v1122_v3  ;;  %v1098_v45 = vunpack.c.h.bf16 %v1096_v39 }
 0x121   : > { %724 = vmatpush.msra.mxu0 %v1121_v7 }
 0x123   : > { %v563_v18 = vpop.permute.xlu1 %562  ;;  %v561_v19 = vpop.permute.xlu0 %560  ;;  %725 = vmatpush.msra.mxu0 %v1118_v11 }
 0x124   : > { %v621_v54 = vpop.permute.xlu2 %620  ;;  %v565_v56 = vsel %vm464_vm3, %v561_v19, %v563_v18  ;;  %v1130_v18 = vld [vmem:[%s1655_s5 + $0x20] sm:$0xff]  }
 0x125   : > { %v569_v4 = vadd.f32 %v565_v56, %v528_v61  ;;  %726 = vmatpush.msra.mxu0 %v1117_v14  ;;  %v1114_v20 = vunpack.c.h.bf16 %v1130_v18  ;;  %v1113_v25 = vunpack.c.l.bf16 %v1130_v18 }
 0x127   : > { %v586_v12 = vadd.f32 %v582_v6, %v569_v4  ;;  %727 = vmatpush.msra.mxu0 %v1114_v20 }
 0x129   : > { %728 = vmatpush.msra.mxu0 %v1113_v25 }
 0x12b   : > { %v619_v41 = vpop.permute.xlu1 %618  ;;  %v617_v42 = vpop.permute.xlu0 %616  ;;  %729 = vmatpush.msra.mxu0 %v1110_v27 }
 0x12c   : > { %v622_v51 = vsel %vm436_vm2, %v615_v29, %v617_v42  ;;  %v623_v10 = vsel %vm436_vm2, %v619_v41, %v621_v54  ;;  %v660_v16 = vpop.permute.xlu2 %659  ;;  %v1128_v29 = vld [vmem:[%s1655_s5 + $0x10] sm:$0xff]  }
 0x12d   : > { %v626_v62 = vadd.f32 %v622_v51, %v585_v55  ;;  %v627_v15 = vadd.f32 %v623_v10, %v586_v12  ;;  %v1106_v35 = vunpack.c.h.bf16 %v1128_v29  ;;  %730 = vmatpush.msra.mxu0 %v1109_v30  ;;  %v1105_v37 = vunpack.c.l.bf16 %v1128_v29 }
 0x12f   : > { %731 = vmatpush.msra.mxu0 %v1106_v35  ;;  %v384_v35 = vld [vmem:[%s1656_s6] sm:$0xf] }
 0x130   : > { %v385_v36 = vunpack.c.l.bf16 %v384_v35 }
 0x131   : > { %732 = vmatpush.msra.mxu0 %v1105_v37  ;;  %v1093_v37 = vld [vmem:[%s1657_s7 + $0x38] sm:$0xff] }
 0x132   : > { %851 = vmatpush.msra.mxu3 %v385_v36  ;;  %911 = vmatpush.bf16.msra.mxu1 %v1093_v37 }
 0x133   : > { %v658_v63 = vpop.permute.xlu1 %657  ;;  %v656_v1 = vpop.permute.xlu0 %655  ;;  %733 = vmatpush.msra.mxu0 %v1102_v38  ;;  %v1092_v38 = vld [vmem:[%s1657_s7 + $0x30] sm:$0xff] }
 0x134   : > { %v663_v2 = vsel %vm464_vm3, %v656_v1, %v658_v63 }
 0x135   : > { %v667_v5 = vadd.f32 %v663_v2, %v626_v62  ;;  %734 = vmatpush.msra.mxu0 %v1101_v40 }
 0x136   : > { %912 = vmatpush.bf16.msra.mxu1 %v1092_v38 }
 0x137   : > { %v1533_v8 = vadd.f32 %v1199_v0, %v667_v5  ;;  %735 = vmatpush.msra.mxu0 %v1098_v45 }
 0x139   : > { %v1041_v13 = vmul.f32 -1.442695, %v1533_v8  ;;  %736 = vmatpush.msra.mxu0 %v1097_v47  ;;  %v1088_v47 = vld [vmem:[%s1657_s7 + $0x10] sm:$0xff] }
 0x13b   : > { %1201 = vpow2.f32 %v1041_v13  ;;  %v662_v17 = vpop.permute.xlu0 %661  ;;  %v350_v13 = vld [vmem:[%s1653_s3] sm:$0xff] }
 0x13c   : > { %v664_v19 = vsel %vm464_vm3, %v660_v16, %v662_v17  ;;  %761 = vmatpush.msra.mxu2 %v350_v13 }
 0x13d   : > { %v668_v21 = vadd.f32 %v664_v19, %v627_v15  ;;  %v351_v15 = vld [vmem:[%s1654_s4] sm:$0x3] }
 0x13e   : > { %1045 = vmatpush.msk.msrb.mxu2 %vm790_vm13, %v351_v15 }
 0x13f   : > { %v673_v28 = vadd.f32 %v1199_v0, %v668_v21 }
 0x141   : > { %v1202_v32 = vpop.eup %1201  ;;  %v1042_v33 = vmul.f32 -1.442695, %v673_v28 }
 0x142   : > { %v680_v34 = vadd.f32 1.0, %v1202_v32 }
 0x143   : > { %1203 = vpow2.f32 %v1042_v33 }
 0x144   : > { %1205 = vrcp.f32 %v680_v34  ;;  %v693_v53 = vand.u32 2147483648, %v680_v34  ;;  %vm687_vm5 = vweird.f32 %v680_v34  ;;  %v691_v54 = vand.u32 2147483647, %v680_v34 }
 0x146   : > { %v694_v62 = vor.u32 1.1754944e-38, %v693_v53  ;;  %vm692_vm8 = vcmp.eq.f32.partialorder %v691_v54, 8.507059e+37 }
 0x149   : > { %v1204_v41 = vpop.eup %1203 }
 0x14a   : > { %v1206_v42 = vpop.eup %1205  ;;  %v681_v43 = vadd.f32 1.0, %v1204_v41  ;;  %v1091_v41 = vld [vmem:[%s1657_s7 + $0x28] sm:$0xff] }
 0x14b   : > { %v683_v46 = vmul.f32 %v1206_v42, %v680_v34  ;;  %vm688_vm4 = vweird.f32 %v1206_v42  ;;  %913 = vmatpush.bf16.msra.mxu1 %v1091_v41 }
 0x14c   : > { %1207 = vrcp.f32 %v681_v43  ;;  %vm689_vm6 = vmor %vm687_vm5, %vm688_vm4  ;;  %v708_v56 = vand.u32 2147483648, %v681_v43  ;;  %v706_v61 = vand.u32 2147483647, %v681_v43  ;;  %vm702_vm9 = vweird.f32 %v681_v43 }
 0x14d   : > { %v684_v48 = vsub.f32 1.0, %v683_v46  ;;  %vm786_vm4 = vcmask 15360   ;;  %v1089_v46 = vld [vmem:[%s1657_s7 + $0x18] sm:$0xff] }
 0x14e   : > { %v709_v1 = vor.u32 1.1754944e-38, %v708_v56  ;;  %vm707_vm11 = vcmp.eq.f32.partialorder %v706_v61, 8.507059e+37  ;;  %v1086_v61 = vld [vmem:[%s1657_s7] sm:$0xff] }
 0x14f   : > { %v685_v49 = vmul.f32 %v1206_v42, %v684_v48 }
 0x151   : > { %v686_v51 = vadd.f32 %v1206_v42, %v685_v49 }
 0x152   : > { %v1208_v50 = vpop.eup %1207 }
 0x153   : > { %v698_v52 = vmul.f32 %v1208_v50, %v681_v43  ;;  %v690_v58 = vsel %vm689_vm6, %v1206_v42, %v686_v51  ;;  %vm703_vm7 = vweird.f32 %v1208_v50  ;;  %v1090_v42 = vld [vmem:[%s1657_s7 + $0x20] sm:$0xff] }
 0x154   : > { %v695_v0 = vsel %vm692_vm8, %v694_v62, %v690_v58  ;;  %vm704_vm10 = vmor %vm702_vm9, %vm703_vm7  ;;  %914 = vmatpush.bf16.msra.mxu1 %v1090_v42  ;;  %v931_v62 = vrot.slane %v1411_v23, 1 }
 0x155   : > { %v699_v55 = vsub.f32 1.0, %v698_v52  ;;  %v1557_v3 = vmul.f32 %v695_v0, %v1533_v8  ;;  %v934_v0 = vrot.slane %v1421_v31, 1 }
 0x157   : > { %v700_v60 = vmul.f32 %v1208_v50, %v699_v55 }
 0x158   : > { %915 = vmatpush.bf16.msra.mxu1 %v1089_v46 }
 0x159   : > { %v701_v63 = vadd.f32 %v1208_v50, %v700_v60  ;;  %v1087_v60 = vld [vmem:[%s1657_s7 + $0x8] sm:$0xff] }
 0x15b   : > { %v705_v59 = vsel %vm704_vm10, %v1208_v50, %v701_v63  ;;  %v932_v63 = vrot.slane %v1413_v24, 1 }
 0x15c   : > { %v710_v2 = vsel %vm707_vm11, %v709_v1, %v705_v59  ;;  %916 = vmatpush.bf16.msra.mxu1 %v1088_v47  ;;  %v935_v1 = vrot.slane %v1409_v22, 1  ;;  %v937_v59 = vrot.slane %v1444_v57, 1 }
 0x15d   : > { %v1559_v4 = vmul.f32 %v710_v2, %v673_v28  ;;  %v939_v2 = vrot.slane %v1433_v44, 1 }
 0x15f   : > { %v714_v5 = vadd.f32 %v1559_v4, %v1557_v3  ;;  %v940_v23 = vsel %vm478_vm0, %v935_v1, %v939_v2 }
 0x160   : > { %917 = vmatpush.bf16.msra.mxu1 %v1087_v60 }
 0x161   : > { %v715_v6 = vrot.slane %v714_v5, 4 }
 0x163   : > { %v716_v7 = vadd.f32 %v715_v6, %v714_v5  ;;  %v933_v5 = vsel %vm478_vm0, %v931_v62, %v932_v63  ;;  %v936_v6 = vsel %vm478_vm0, %v934_v0, %v935_v1 }
 0x164   : > { %918 = vmatpush.bf16.msra.mxu1 %v1086_v61 }
 0x165   : > { %v717_v9 = vrot.slane %v716_v7, 2 }
 0x167   : > { %v718_v10 = vadd.f32 %v717_v9, %v716_v7  ;;  %v1189_v7 = vpack.i.bf16 %v936_v6, %v933_v5  ;;  %v938_v9 = vsel %vm478_vm0, %v932_v63, %v937_v59 }
 0x168   : > { %v1194_v24 = vpack.i.bf16 %v940_v23, %v938_v9 }
 0x169   : > { %v719_v11 = vrot.slane %v718_v10, 1  ;;  %1190 = vrot.lane.b32.xlu1 %v1189_v7, %s1283_s28 }
 0x16a   : > { %1195 = vrot.lane.b32.xlu2 %v1194_v24, %s1283_s28  ;;  %s1094_s28 = sshll.u32 %s1357_s13, 4  ;;  %s958_s13 = scalar_lea.sflag [#allocation3], %s323_s25 }
 0x16b   : > { %v720_v12 = vadd.f32 %v719_v11, %v718_v10  ;;  %s969_s22 = scalar_lea.hbm %s1659_s9, %s1094_s28 }
 0x16c   : > { %s972_s24 = sshll.u32 %s969_s22, 4  ;;  %s973_s24 = int_to_ptr.hbm [resolvable:$true] %s972_s24 }
 0x16d   : > { %737 = vmatmul.f32.vlgmr.msra.gmra.mxu0 %v720_v12  ;;  %s1231_s26 = sshra.s32 %s973_s24, 4  ;;  %s1232_s26 = int_to_ptr.hbm [resolvable:$true] %s1231_s26 }
 0x16e   : > { %s1233_s27 = scalar_lea.hbm %s1232_s26, 16  ;;  %p1238_p0 = scmp.lt.s32.totalorder %s1232_s26, %s1659_s9 }
 0x16f   : > { %p1234_p11 = scmp.ne.s32.totalorder %s1232_s26, %s1233_s27  ;;  %p1239_p1 = scmp.lt.s32.totalorder %s1237_s16, %s1233_s27 }
 0x171   : > { %p1235_p12 = pnand %p1234_p11, %p1374_p5  ;;  %p1240_p2 = por %p1239_p1, %p1238_p0 }
 0x173   : > { %p1236_p13 = pneg %p1235_p12 }
 0x175   : > { %p1241_p3 = pnand %p1240_p2, %p1236_p13 }
 0x1db   : > { %v1191_v11 = vpop.permute.xlu1 %1190 }
 0x1dc   : > { %v1193_v12 = vunpack.i.h.bf16 %v1191_v11  ;;  %v1192_v13 = vunpack.i.l.bf16 %v1191_v11 }
 0x1de   : > { %v949_v15 = vsel %vm436_vm2, %v1192_v13, %v1193_v12 }
 0x1ea   : > { %v738_v14 = vpop.f32.mrf.mxu0 }
 0x1eb   : > { %v741_v8 = vmul.f32 0.00390625, %v738_v14  ;;  %v1200_v14 = vld [vmem:[%s1658_s8] ss:$0 sm:$0xff] }
 0x1ed   : > { %1043 = vmatmul.msk.f32.vlgmr.msra.gmra.mxu2 %vm742_vm12, %v741_v8 }
 0x270   : > { %v763_v16 = vpop.f32.mrf.mxu2 }
 0x271   : > { %v1044_v17 = vmul.f32 -1.442695, %v763_v16 }
 0x273   : > { %1209 = vpow2.f32 %v1044_v17  ;;  %v1196_v17 = vpop.permute.xlu2 %1195 }
 0x279   : > { %v1210_v18 = vpop.eup %1209 }
 0x27a   : > { %v769_v19 = vadd.f32 1.0, %v1210_v18  ;;  %v1198_v18 = vunpack.i.h.bf16 %v1196_v17 }
 0x27c   : > { %1211 = vrcp.f32 %v769_v19  ;;  %v781_v26 = vand.u32 2147483648, %v769_v19  ;;  %v779_v28 = vand.u32 2147483647, %v769_v19  ;;  %vm775_vm15 = vweird.f32 %v769_v19 }
 0x27e   : > { %v782_v30 = vor.u32 1.1754944e-38, %v781_v26  ;;  %vm780_vm3 = vcmp.eq.f32.partialorder %v779_v28, 8.507059e+37 }
 0x282   : > { %v1212_v20 = vpop.eup %1211 }
 0x283   : > { %v771_v21 = vmul.f32 %v1212_v20, %v769_v19  ;;  %vm776_vm14 = vweird.f32 %v1212_v20 }
 0x284   : > { %vm777_vm1 = vmor %vm775_vm15, %vm776_vm14 }
 0x285   : > { %v772_v25 = vsub.f32 1.0, %v771_v21 }
 0x287   : > { %v773_v27 = vmul.f32 %v1212_v20, %v772_v25 }
 0x289   : > { %v774_v29 = vadd.f32 %v1212_v20, %v773_v27 }
 0x28b   : > { %v778_v32 = vsel %vm777_vm1, %v1212_v20, %v774_v29 }
 0x28c   : > { %v783_v33 = vsel %vm780_vm3, %v782_v30, %v778_v32 }
 0x28d   : > { %v785_v34 = vmul.f32 %v783_v33, %v763_v16 }
 0x28f   : > { %1046 = vmatmul.msk.f32.vlgmr.msrb.gmra.mxu2 %vm786_vm4, %v785_v34 }
 0x312   : > { %v811_v39 = vpop.f32.mrf.mxu2 }
 0x313   : > { %v1047_v40 = vmul.f32 -1.442695, %v811_v39 }
 0x315   : > { %1213 = vpow2.f32 %v1047_v40 }
 0x31b   : > { %v1214_v43 = vpop.eup %1213 }
 0x31c   : > { %v817_v45 = vadd.f32 1.0, %v1214_v43 }
 0x31e   : > { %1215 = vrcp.f32 %v817_v45  ;;  %v829_v51 = vand.u32 2147483648, %v817_v45  ;;  %v827_v53 = vand.u32 2147483647, %v817_v45  ;;  %vm823_vm6 = vweird.f32 %v817_v45 }
 0x320   : > { %v830_v55 = vor.u32 1.1754944e-38, %v829_v51  ;;  %vm828_vm8 = vcmp.eq.f32.partialorder %v827_v53, 8.507059e+37 }
 0x324   : > { %v1216_v48 = vpop.eup %1215 }
 0x325   : > { %v819_v49 = vmul.f32 %v1216_v48, %v817_v45  ;;  %vm824_vm5 = vweird.f32 %v1216_v48 }
 0x326   : > { %vm825_vm7 = vmor %vm823_vm6, %vm824_vm5 }
 0x327   : > { %v820_v50 = vsub.f32 1.0, %v819_v49 }
 0x329   : > { %v821_v52 = vmul.f32 %v1216_v48, %v820_v50 }
 0x32b   : > { %v822_v54 = vadd.f32 %v1216_v48, %v821_v52 }
 0x32d   : > { %v826_v56 = vsel %vm825_vm7, %v1216_v48, %v822_v54 }
 0x32e   : > { %v831_v58 = vsel %vm828_vm8, %v830_v55, %v826_v56 }
 0x32f   : > { %1048 = vmatmul.msk.f32.vlgmr.msra.gmra.mxu3 %vm742_vm12, %v831_v58 }
 0x3b2   : > { %v853_v22 = vpop.f32.mrf.mxu3 }
 0x3b3   : > { %v856_v31 = vperm.slane %v853_v22, 0 }
 0x3b5   : > { %v857_v44 = vmul.f32 %v856_v31, %v1557_v3  ;;  %v858_v57 = vmul.f32 %v856_v31, %v1559_v4  ;;  %v1197_v4 = vunpack.i.l.bf16 %v1196_v17 }
 0x3b7   : > { %v859_v10 = vpack.c.bf16 %v858_v57, %v857_v44  ;;  %v950_v20 = vsel %vm436_vm2, %v1197_v4, %v1198_v18 }
 0x3b9   : > { %919 = vmatmul.bf16.vlgmr.msra.gmra.mxu1 %v859_v10 }
 0x436   : > { %v920_v8 = vpop.f32.mrf.mxu1 }
 0x437   : > { %v921_v16 = vadd.f32 %v1200_v14, %v920_v8 }
 0x439   : > { %v953_v3 = vadd.f32 %v949_v15, %v921_v16 }
 0x43b   : > { %955 = vst [vmem:[%s325_s14] sm:$0xff] %v953_v3 }
 0x43e   : > { %v922_v19 = vpop.f32.mrf.mxu1 }
 0x43f   : > { %v923_v21 = vadd.f32 %v1200_v14, %v922_v19 }
 0x441   : > { %v954_v25 = vadd.f32 %v950_v20, %v923_v21 }
 0x443   : > { %956 = vst [vmem:[%s325_s14 + $0x8] sm:$0xff] %v954_v25 }
 0x444   : > { %1244 = shalt.err (!%p1241_p3)
}
 0x445   : > { %s1285_s25 = smov 128   ;;  %s1663_s14 = smov 8  }
 0x446   : > { %1135 = dma.vmem_to_hbm [thread:$0]  (%p1374_p5), %s971_s23, 256, %s973_s24, %s958_s13, %s1285_s25, %s1285_s25, %s1663_s14  }
 0x447 PF: > { %p1141_p4 = scmp.ge.s32.totalorder %s1279_s12, 2  ;;  %s987_s22 = sand.u32 1, %s1267_s30  }
 0x448   : > { %s988_s21 = scalar_lea.sflag [#allocation3], %s987_s22 }
 0x449   : > { %p1138_p7 = pnand %p1141_p4, %p1378_p6 }
 0x44b   : > { %p1139_p8 = pneg %p1138_p7 }
 0x44d   : > { %1262 = dma.done.wait (%p1139_p8), %s988_s21, 256  }
 0x44e   : > { %1264 = vsyncadd (%p1139_p8), %s988_s21, 4294967040  ;;  %p19_p9 = scmp.ge.s32.totalorder %s1361_s15, 4   ;;  %s1664_s30 = smov %s1271_s10 }
 0x44f   : > { %s1665_s10 = smov %s1275_s11  ;;  %s1666_s11 = smov %s1372_s18 }
 0x450   : > { %s1667_s12 = smov %s1361_s15  ;;  %21 = sbr.rel (!%p19_p9) target bundleno = 3 (0x3), region = 91 }
 0x455   :  { %994 = vsyncpa [#allocation3], 1 }
 0x456   :  { %996 = vsyncpa [#allocation3 + $0x1], 1 }

</bundles_post_ra>
